<compile_context>
chip_gen: v7x
topology: tpu7x:2x2x1
jax: 0.10.0
libtpu: 0.0.40
codegen_flags: <defaults>
</compile_context>

<pallas_src>
import functools

import jax
import jax.numpy as jnp
from jax.experimental import pallas as pl
from jax.experimental.pallas import tpu as pltpu


def _round_up(x, m):
    return ((x + m - 1) // m) * m


def _conv1d_kernel(x_ref, w_ref, b_ref, o_ref, *, K, TT):
    # x_ref: (Tp + K - 1, Cin)  zero-padded time slab for the current batch
    # w_ref: (K, Cin, Cout)     w_ref[k][ci, co] == torch_weight[co, ci, k]
    # b_ref: (1, Cout)
    # o_ref: (TT, Cout)         lane-dense output tile (Cout = embedding_dim = 128)
    j = pl.program_id(1)
    t0 = pl.multiple_of(j * TT, TT)
    cout = o_ref.shape[-1]

    acc = jnp.zeros((TT, cout), jnp.float32)
    for k in range(K):  # K == 3: unrolled at trace time
        xk = x_ref[pl.ds(t0 + k, TT), :]                      # (TT, Cin) shifted window
        acc = acc + jnp.dot(xk, w_ref[k],
                            preferred_element_type=jnp.float32)
    o_ref[...] = (acc + b_ref[...].astype(jnp.float32)).astype(o_ref.dtype)


def conv1d_embedder_forward(history_data, weight, bias):
    """Conv1DEmbedder.forward.

    history_data: (B, T, Cin)          (same layout the PyTorch module receives)
    weight:       (Cout, Cin, K)       PyTorch nn.Conv1d weight layout
    bias:         (Cout,)
    returns:      (B, T, Cout)
    """
    B, T, Cin = history_data.shape
    Cout, Cin_w, K = weight.shape
    assert Cin_w == Cin
    pad = (K - 1) // 2                       # PyTorch padding=1 for k=3 ('same')

    TT = min(512, _round_up(T, 8))           # sublane-aligned rows per grid step
    Tp = _round_up(T, TT)

    # Zero-pad time: `pad` on the left, `pad` + tile-remainder on the right so
    # every tile's K-wide window stays in bounds.  Second dim == Tp + K - 1.
    xp = jnp.pad(history_data, ((0, 0), (pad, pad + Tp - T), (0, 0)))

    w = jnp.transpose(weight, (2, 1, 0))     # (K, Cin, Cout)
    b2 = bias.reshape(1, Cout)

    kernel = functools.partial(_conv1d_kernel, K=K, TT=TT)
    out = pl.pallas_call(
        kernel,
        out_shape=jax.ShapeDtypeStruct((B, Tp, Cout), history_data.dtype),
        grid=(B, Tp // TT),
        in_specs=[
            # Full padded time slab for this batch (tiny: Cin = 3 channels).
            pl.BlockSpec((None, Tp + K - 1, Cin), lambda b, j: (b, 0, 0)),
            # Full weight (K, Cin, Cout) ~ 4.5 KiB, resident every step.
            pl.BlockSpec((K, Cin, Cout), lambda b, j: (0, 0, 0)),
            pl.BlockSpec((1, Cout), lambda b, j: (0, 0)),
        ],
        out_specs=pl.BlockSpec((None, TT, Cout), lambda b, j: (b, j, 0)),
        compiler_params=pltpu.CompilerParams(
            dimension_semantics=("parallel", "parallel")),
    )(xp, w, b2)
    return out[:, :T, :]


if __name__ == "__main__":
    key = jax.random.PRNGKey(0)
    k_x, k_w, k_b = jax.random.split(key, 3)

    B, T, CIN = 2, 8, 3
    EMB = 128          # embedding_dim (module default)
    KS = 3             # kernel size

    history = jax.random.normal(k_x, (B, T, CIN), dtype=jnp.float32)
    fan_in = CIN * KS
    lim = 1.0 / (fan_in ** 0.5)
    weight = jax.random.uniform(k_w, (EMB, CIN, KS), jnp.float32, -lim, lim)
    bias = jax.random.uniform(k_b, (EMB,), jnp.float32, -lim, lim)

    fwd = jax.jit(conv1d_embedder_forward)
    out = jax.block_until_ready(fwd(history, weight, bias))
    assert out.shape == (B, T, EMB), out.shape
    assert bool(jnp.all(jnp.isfinite(out)))

    # Plain-JAX reference with the exact PyTorch Conv1d semantics.
    xp_ref = jnp.pad(history, ((0, 0), (1, 1), (0, 0)))
    windows = jnp.stack([xp_ref[:, k:k + T, :] for k in range(KS)], axis=2)  # (B,T,K,Cin)
    ref = jnp.einsum("btkc,ock->bto", windows, weight) + bias
    err = float(jnp.max(jnp.abs(out - ref)))
    assert jnp.allclose(out, ref, atol=1e-4, rtol=1e-4), err

    print("KERNEL_OK")
</pallas_src>

<mosaic_0001>
module attributes {stable_mosaic.version = 11 : i64} {
  func.func @_conv1d_kernel(%arg0: i32, %arg1: i32, %arg2: memref<1x10x3xf32, #tpu.memory_space<vmem>>, %arg3: memref<3x3x128xf32, #tpu.memory_space<vmem>>, %arg4: memref<1x128xf32, #tpu.memory_space<vmem>>, %arg5: memref<1x8x128xf32, #tpu.memory_space<vmem>>) attributes {dimension_semantics = [#tpu.dimension_semantics<parallel>, #tpu.dimension_semantics<parallel>], iteration_bounds = array<i64: 2, 1>, scalar_prefetch = 0 : i64, scratch_operands = 0 : i64, tpu.core_type = #tpu.core_type<tc>, window_params = [{transform_indices = @transform_0, window_bounds = array<i64: 1, 10, 3>}, {pipeline_mode = #tpu.pipeline_mode<synchronous>, transform_indices = @transform_1, window_bounds = array<i64: 3, 3, 128>}, {pipeline_mode = #tpu.pipeline_mode<synchronous>, transform_indices = @transform_2, window_bounds = array<i64: 1, 128>}, {transform_indices = @transform_3, window_bounds = array<i64: 1, 8, 128>}]} {
    %c8_i32 = arith.constant 8 : i32
    %0 = arith.muli %arg1, %c8_i32 : i32
    %1 = tpu.assume_multiple %0, 8 : i32
    %cst = arith.constant 0.000000e+00 : f32
    %2 = vector.broadcast %cst : f32 to vector<8x128xf32>
    %c0_i32 = arith.constant 0 : i32
    %3 = arith.addi %1, %c0_i32 : i32
    %c0 = arith.constant 0 : index
    %4 = arith.index_cast %3 : i32 to index
    %c0_0 = arith.constant 0 : index
    %5 = vector.load %arg2[%c0, %4, %c0_0] : memref<1x10x3xf32, #tpu.memory_space<vmem>>, vector<1x8x3xf32>
    %6 = vector.shape_cast %5 : vector<1x8x3xf32> to vector<8x3xf32>
    %c0_1 = arith.constant 0 : index
    %c0_2 = arith.constant 0 : index
    %c0_3 = arith.constant 0 : index
    %7 = vector.load %arg3[%c0_1, %c0_2, %c0_3] : memref<3x3x128xf32, #tpu.memory_space<vmem>>, vector<1x3x128xf32>
    %8 = vector.shape_cast %7 : vector<1x3x128xf32> to vector<3x128xf32>
    %cst_4 = arith.constant dense<0.000000e+00> : vector<8x128xf32>
    %9 = tpu.matmul %6, %8, %cst_4 {dimension_numbers = #tpu.dot_dimension_numbers<[1], [0], [0], [1], [0, 0, 1, 1], [], []>} : vector<8x3xf32>, vector<3x128xf32>, vector<8x128xf32> -> vector<8x128xf32>
    %10 = arith.addf %2, %9 : vector<8x128xf32>
    %c1_i32 = arith.constant 1 : i32
    %11 = arith.addi %1, %c1_i32 : i32
    %c0_5 = arith.constant 0 : index
    %12 = arith.index_cast %11 : i32 to index
    %c0_6 = arith.constant 0 : index
    %13 = vector.load %arg2[%c0_5, %12, %c0_6] : memref<1x10x3xf32, #tpu.memory_space<vmem>>, vector<1x8x3xf32>
    %14 = vector.shape_cast %13 : vector<1x8x3xf32> to vector<8x3xf32>
    %c1 = arith.constant 1 : index
    %c0_7 = arith.constant 0 : index
    %c0_8 = arith.constant 0 : index
    %15 = vector.load %arg3[%c1, %c0_7, %c0_8] : memref<3x3x128xf32, #tpu.memory_space<vmem>>, vector<1x3x128xf32>
    %16 = vector.shape_cast %15 : vector<1x3x128xf32> to vector<3x128xf32>
    %cst_9 = arith.constant dense<0.000000e+00> : vector<8x128xf32>
    %17 = tpu.matmul %14, %16, %cst_9 {dimension_numbers = #tpu.dot_dimension_numbers<[1], [0], [0], [1], [0, 0, 1, 1], [], []>} : vector<8x3xf32>, vector<3x128xf32>, vector<8x128xf32> -> vector<8x128xf32>
    %18 = arith.addf %10, %17 : vector<8x128xf32>
    %c2_i32 = arith.constant 2 : i32
    %19 = arith.addi %1, %c2_i32 : i32
    %c0_10 = arith.constant 0 : index
    %20 = arith.index_cast %19 : i32 to index
    %c0_11 = arith.constant 0 : index
    %21 = vector.load %arg2[%c0_10, %20, %c0_11] : memref<1x10x3xf32, #tpu.memory_space<vmem>>, vector<1x8x3xf32>
    %22 = vector.shape_cast %21 : vector<1x8x3xf32> to vector<8x3xf32>
    %c2 = arith.constant 2 : index
    %c0_12 = arith.constant 0 : index
    %c0_13 = arith.constant 0 : index
    %23 = vector.load %arg3[%c2, %c0_12, %c0_13] : memref<3x3x128xf32, #tpu.memory_space<vmem>>, vector<1x3x128xf32>
    %24 = vector.shape_cast %23 : vector<1x3x128xf32> to vector<3x128xf32>
    %cst_14 = arith.constant dense<0.000000e+00> : vector<8x128xf32>
    %25 = tpu.matmul %22, %24, %cst_14 {dimension_numbers = #tpu.dot_dimension_numbers<[1], [0], [0], [1], [0, 0, 1, 1], [], []>} : vector<8x3xf32>, vector<3x128xf32>, vector<8x128xf32> -> vector<8x128xf32>
    %26 = arith.addf %18, %25 : vector<8x128xf32>
    %c0_15 = arith.constant 0 : index
    %c0_16 = arith.constant 0 : index
    %27 = vector.load %arg4[%c0_15, %c0_16] : memref<1x128xf32, #tpu.memory_space<vmem>>, vector<1x128xf32>
    %28 = vector.broadcast %27 : vector<1x128xf32> to vector<8x128xf32>
    %29 = arith.addf %26, %28 : vector<8x128xf32>
    %c0_17 = arith.constant 0 : index
    %c0_18 = arith.constant 0 : index
    %c0_19 = arith.constant 0 : index
    %30 = vector.load %arg5[%c0_17, %c0_18, %c0_19] : memref<1x8x128xf32, #tpu.memory_space<vmem>>, vector<1x8x128xf32>
    %31 = vector.shape_cast %30 : vector<1x8x128xf32> to vector<8x128xf32>
    %32 = vector.shape_cast %29 : vector<8x128xf32> to vector<1x8x128xf32>
    tpu.vector_store %arg5[%c0_17, %c0_18, %c0_19], %32 {strides = array<i32>} : memref<1x8x128xf32, #tpu.memory_space<vmem>>, vector<1x8x128xf32>,
    return
  }
  func.func @transform_0(%arg0: i32, %arg1: i32) -> (i32, i32, i32) {
    %c0_i32 = arith.constant 0 : i32
    %c0_i32_0 = arith.constant 0 : i32
    %c0_i32_1 = arith.constant 0 : i32
    return %arg0, %c0_i32, %c0_i32_0 : i32, i32, i32
  }
  func.func @transform_1(%arg0: i32, %arg1: i32) -> (i32, i32, i32) {
    %c0_i32 = arith.constant 0 : i32
    %c0_i32_0 = arith.constant 0 : i32
    %c0_i32_1 = arith.constant 0 : i32
    %c0_i32_2 = arith.constant 0 : i32
    return %c0_i32, %c0_i32_0, %c0_i32_1 : i32, i32, i32
  }
  func.func @transform_2(%arg0: i32, %arg1: i32) -> (i32, i32) {
    %c0_i32 = arith.constant 0 : i32
    %c0_i32_0 = arith.constant 0 : i32
    %c0_i32_1 = arith.constant 0 : i32
    return %c0_i32, %c0_i32_0 : i32, i32
  }
  func.func @transform_3(%arg0: i32, %arg1: i32) -> (i32, i32, i32) {
    %c0_i32 = arith.constant 0 : i32
    %c0_i32_0 = arith.constant 0 : i32
    return %arg0, %arg1, %c0_i32 : i32, i32, i32
  }
}

</mosaic_0001>

<bundles_post_ra>
// kernel: conv1d_embedder_forward.1
= control target key start
LH: loop header
LB: loop body
LE: loop exit
PB: predicated region body
PF: predicated region fallthrough
CT: control target
= control target key end

     0   :  { %8 = vsyncpa [#allocation3], 0  ;;  %s860_s0 = inlined_call_operand.vmem [shape: f32[2,10,3], index: 0, kind: input, shape index: {}]   ;;  %s861_s1 = inlined_call_operand.vmem [shape: f32[3,3,128], index: 1, kind: input, shape index: {}]   ;;  %s862_s2 = inlined_call_operand.vmem [shape: f32[1,128], index: 2, kind: input, shape index: {}]   ;;  %s863_s3 = inlined_call_operand.hbm [shape: f32[2,8,128], index: 3, kind: output, shape index: {}]  }
   0x1   :  { %10 = vsyncpa [#allocation3 + $0x1], 0  ;;  %s733_s12 = smov 0   ;;  %s735_s13 = smov 0  }
   0x2   :  { %s737_s14 = smov 0   ;;  %s739_s15 = smov 0  }
   0x3   :  { %s741_s16 = smov 0   ;;  %s743_s17 = smov 0  }
   0x4 LB: > { %s528_s18 = sadd.s32 4294967295, %s708_s17   ;;  %s529_s19 = sadd.s32 4294967294, %s708_s17   ;;  %s708_s17 = sphi %s743_s17, %s16_s17   ;;  %s704_s16 = sphi %s741_s16, %s870_s16   ;;  %s700_s15 = sphi %s739_s15, %s869_s15   ;;  %s696_s14 = sphi %s737_s14, %s868_s14   ;;  %s692_s13 = sphi %s735_s13, %s867_s13   ;;  %s688_s12 = sphi %s733_s12, %s866_s12  }
   0x5   : > { %s28_s20 = sadd.s32 1, %s704_s16  ;;  %s105_s21 = sadd.s32 1, %s696_s14 }
   0x6   : > { %p30_p0 = scmp.ge.s32.totalorder %s28_s20, 2  ;;  %p115_p1 = scmp.ne.s32.totalorder %s696_s14, %s692_s13 }
   0x7   : > { %p116_p2 = scmp.eq.s32.totalorder %s528_s18, 1  ;;  %p121_p3 = scmp.ne.s32.totalorder %s692_s13, %s688_s12 }
   0x8   : > { %s872_s20 = smov (%p30_p0, %s28_s20), 0  ;;  %p122_p5 = scmp.eq.s32.totalorder %s529_s19, 1 }
   0x9   : > { %p773_p4 = por %p116_p2, %p115_p1  ;;  %s100_s23 = ssub.s32 %s704_s16, %s872_s20 }
   0xa   : > { %p532_p6 = scmp.ge.s32.totalorder %s708_s17, 1  ;;  %p103_p7 = scmp.eq.s32.totalorder %s100_s23, 0 }
   0xb   : > { %p780_p8 = por %p122_p5, %p121_p3  ;;  %p154_p9 = scmp.lt.s32.totalorder %s708_s17, 3 }
   0xc   : > { %s786_s25 = scalar_select %p103_p7, %s696_s14, %s105_s21  }
   0xd   : > { %p155_p10 = pnand %p532_p6, %p154_p9 }
   0xe   : > { %v537_v0 = vld [vmem:[%s861_s1 + $0x4] sm:$0x7] (!%p155_p10)  ;;  %vm196_vm0 = vcmask (!%p155_p10), 1042432   ;;  %p178_p11 = scmp.lt.s32.totalorder (!%p155_p10), %s700_s15, 1  ;;  %v710_v1 = vmov (!%p155_p10), 0.0   ;;  %vm711_vm1 = vmmov (!%p155_p10), 0  }
   0xf   : > { %158 = sbr.rel (%p155_p10) target bundleno = 261 (0x105), region = 32  ;;  %558 = vmatprep.subr.mxu0 (!%p155_p10), %v710_v1  ;;  %563 = vmatprep.subr.mxu1 (!%p155_p10), %v710_v1  ;;  %v186_v2 = vld [vmem:[%s861_s1] sm:$0x7] (!%p155_p10)  ;;  %vm192_vm2 = vcmask (!%p155_p10), 23552   ;;  %v543_v3 = vld [vmem:[%s861_s1 + $0x8] sm:$0x7] (!%p155_p10) }
  0x10   : > { %559 = vmatpush3.msk.msra.mxu0 (!%p155_p10), %vm196_vm0, %v537_v0  ;;  %560 = vmatprep.mubr.msk.f32.mxu0 (!%p155_p10), %vm711_vm1, %v710_v1  ;;  %s175_s10 = sand.u32 (!%p155_p10), 1, %s692_s13   ;;  %v546_v13 = vld [vmem:[%s862_s2] ss:$0 sm:$0xff] (!%p155_p10)  ;;  %s548_s21 = sshll.u32 (!%p155_p10), %s700_s15, 7 }
  0x11   : > { %564 = vmatpush3.msk.msra.mxu1 (!%p155_p10), %vm196_vm0, %v186_v2  ;;  %565 = vmatprep.mubr.msk.f32.mxu1 (!%p155_p10), %vm711_vm1, %v710_v1  ;;  %s533_s11 = sshll.u32 (!%p155_p10), %s175_s10, 3  ;;  %s813_s29 = scalar_lea.hbm (!%p155_p10), %s863_s3, %s548_s21 }
  0x12   : > { %568 = vmatprep.subr.mxu0 (!%p155_p10), %v710_v1  ;;  %s177_s23 = scalar_lea.vmem (!%p155_p10), [#allocation2], %s533_s11 }
  0x13   : > { %s452_s26 = sshll.u32 (!%p155_p10), %s177_s23, 4  ;;  %s815_s26 = int_to_ptr.vmem [resolvable:$true] %s452_s26 }
  0x16   : > { %s179_s30 = scalar_select %p178_p11, %s700_s15, 1 }
  0x17   : > { %s712_s15 = smov [#allocation2]  }
  0x18   : > { %s551_s4 = sshll.u32 %s179_s30, 4  ;;  %s438_s30 = scalar_lea.sflag [#allocation3], %s175_s10 }
  0x19   : > { %s182_s7 = scalar_lea.vmem %s860_s0, %s551_s4  ;;  %s630_s4 = scalar_lea.vmem %s815_s26, 128 }
  0x1a   : > { %v536_v4 = vld [vmem:[%s182_s7 + $0x1] sm:$0xff]  ;;  %p631_p12 = scmp.ne.s32.totalorder %s815_s26, %s630_s4  ;;  %s634_s5 = sshll.u32 %s712_s15, 4  ;;  %s635_s5 = int_to_ptr.vmem [resolvable:$false] %s634_s5 }
  0x1b   : > { %v185_v5 = vld [vmem:[%s182_s7] sm:$0xff]  ;;  %561 = vmatmul.mubr.msk.f32.vlgmr.msra.gmra.mrb[0].mxu0 %vm192_vm2, %v536_v4  ;;  %s636_s6 = scalar_lea.vmem %s635_s5, 256  ;;  %p637_p1 = scmp.lt.s32.totalorder %s815_s26, %s635_s5 }
  0x1c   : > { %566 = vmatmul.mubr.msk.f32.vlgmr.msra.gmra.mrb[0].mxu1 %vm192_vm2, %v185_v5  ;;  %569 = vmatpush3.msk.msra.mxu0 %vm196_vm0, %v543_v3  ;;  %v542_v6 = vld [vmem:[%s182_s7 + $0x2] sm:$0xff]  ;;  %p632_p13 = pnand %p631_p12, %p773_p4  ;;  %p638_p2 = scmp.lt.s32.totalorder %s636_s6, %s630_s4 }
  0x1d   : > { %570 = vmatprep.mubr.msk.f32.mxu0 %vm711_vm1, %v710_v1 }
  0x1e   : > { %p633_p0 = pneg %p632_p13  ;;  %p639_p3 = por %p638_p2, %p637_p1 }
  0x1f   : > { %571 = vmatmul.mubr.msk.f32.vlgmr.msra.gmra.mrb[2].mxu0 %vm192_vm2, %v542_v6 }
  0x20   : > { %p640_p5 = pnand %p639_p3, %p633_p0 }
  0xee   : > { %v266_v7 = vpop.f32.mrb[0].mxu0 }
  0xef   : > { %v342_v8 = vpop.f32.mrb[0].mxu1  ;;  %v562_v10 = vpop.f32.mrb[1].mxu0 }
  0xf0   : > { %v343_v9 = vadd.f32 %v342_v8, %v266_v7  ;;  %v567_v11 = vpop.f32.mrb[1].mxu1 }
  0xf2   : > { %v423_v12 = vpop.f32.mrb[2].mxu0 }
  0xf3   : > { %v427_v14 = vadd.f32 %v423_v12, %v343_v9  ;;  %v572_v15 = vpop.f32.mrb[3].mxu0 }
  0xf5   : > { %v435_v16 = vadd.f32 %v546_v13, %v427_v14 }
  0xf7   : > { %436 = vst [vmem:[%s177_s23] sm:$0xff] %v435_v16 }
  0xf8   : > { %643 = shalt.err (!%p640_p5)
}
  0xf9   : > { %s644_s7 = scalar_lea.hbm %s813_s29, 128  ;;  %s648_s10 = scalar_lea.hbm %s863_s3, 256 }
  0xfa   : > { %p645_p6 = scmp.ne.s32.totalorder %s813_s29, %s644_s7  ;;  %p649_p10 = scmp.lt.u32.totalorder %s813_s29, %s863_s3 }
  0xfb   : > { %p650_p11 = scmp.lt.u32.totalorder %s648_s10, %s644_s7  ;;  %p652_p13 = scmp.lt.u32.totalorder %s644_s7, %s813_s29 }
  0xfc   : > { %p646_p7 = pnand %p645_p6, %p773_p4 }
  0xfd   : > { %p651_p12 = por %p650_p11, %p649_p10 }
  0xfe   : > { %p647_p9 = pneg %p646_p7 }
  0xff   : > { %p653_p0 = por %p652_p13, %p651_p12 }
 0x101   : > { %p654_p1 = pnand %p653_p0, %p647_p9 }
 0x103   : > { %657 = shalt.err (!%p654_p1)
}
 0x104   : > { %573 = dma.vmem_to_hbm [thread:$0]  (%p773_p4), %s815_s26, 128, %s813_s29, %s438_s30  }
 0x105 PF: > { %p579_p2 = scmp.ge.s32.totalorder %s708_s17, 2  ;;  %s464_s19 = sand.u32 1, %s688_s12  }
 0x106   : > { %s465_s21 = scalar_lea.sflag [#allocation3], %s464_s19 }
 0x107   : > { %p576_p3 = pnand %p579_p2, %p780_p8 }
 0x109   : > { %683 = dma.done.wait (!%p576_p3), %s465_s21, 128  }
 0x10a   : > { %685 = vsyncadd (!%p576_p3), %s465_s21, 4294967168  ;;  %s16_s17 = sadd.s32 1, %s708_s17   ;;  %s866_s12 = smov %s692_s13 }
 0x10b   : > { %p13_p5 = scmp.ge.s32.totalorder %s16_s17, 4   ;;  %s867_s13 = smov %s696_s14 }
 0x10c   : > { %s868_s14 = smov %s786_s25  ;;  %s869_s15 = smov %s704_s16 }
 0x10d   : > { %s870_s16 = smov %s872_s20  ;;  %15 = sbr.rel (!%p13_p5) target bundleno = 4 (0x4), region = 72 }
 0x114   :  { %470 = vsyncpa [#allocation3], 1 }
 0x115   :  { %472 = vsyncpa [#allocation3 + $0x1], 1 }

</bundles_post_ra>
